<compile_context>
chip_gen: v7x
topology: tpu7x:2x2x1
jax: 0.10.0
libtpu: 0.0.40
codegen_flags: <defaults>
</compile_context>

<pallas_src>
import jax
import jax.numpy as jnp
from jax.experimental import pallas as pl
from jax.experimental.pallas import tpu as pltpu


def channel_attention_kernel(x_ref, w1_ref, b1_ref, w2_ref, b2_ref, o_ref):
    """One row-tile of ChannelAttention. Works for any (rows, C) tile."""
    x = x_ref[...]                                                   # (R, C)

    # fc1 + ReLU  (MXU matmul, f32 accumulate; elementwise kept in f32)
    h = jnp.dot(x, w1_ref[...], preferred_element_type=jnp.float32)  # (R, H)
    h = jnp.maximum(h + b1_ref[...].astype(jnp.float32), 0.0)

    # fc2 + sigmoid gate
    y = jnp.dot(h, w2_ref[...], preferred_element_type=jnp.float32)  # (R, C)
    gate = jax.nn.sigmoid(y + b2_ref[...].astype(jnp.float32))       # f32

    # Final multiply in x's dtype (no separate f32 materialization of x).
    o_ref[...] = (x * gate.astype(x.dtype)).astype(o_ref.dtype)


def channel_attention(x, w1t, b1, w2t, b2, *, block_rows=1024):
    """ChannelAttention forward.

    x:   (N, C)   rows = batch (or flattened batch*spatial), channels last.
    w1t: (C, H)   fc1.weight transposed (H = C // reduction)
    b1:  (1, H)
    w2t: (H, C)   fc2.weight transposed
    b2:  (1, C)
    """
    N, C = x.shape
    H = w1t.shape[1]

    # Second-minor block dim must be a multiple of 8 -> round caller value up.
    block_rows = max(8, ((int(block_rows) + 7) // 8) * 8)

    # Native bf16 x bf16 MXU matmul for bf16 inputs (f32 accumulate kept).
    if x.dtype == jnp.bfloat16:
        w1t = w1t.astype(jnp.bfloat16)
        w2t = w2t.astype(jnp.bfloat16)

    # ---- Lane-dense packing: (N, C<128) -> (N/p, 128) with block-diag fcs. ----
    pack = 1
    if N > block_rows and C < 128 and 128 % C == 0:
        p = 128 // C
        if N % p == 0:
            pack = p

    if pack > 1:
        x_in = x.reshape(N // pack, C * pack)          # metadata-only reshape
        eye = jnp.eye(pack)
        w1 = jnp.kron(eye.astype(w1t.dtype), w1t)      # (C*p, H*p) block-diag
        w2 = jnp.kron(eye.astype(w2t.dtype), w2t)      # (H*p, C*p) block-diag
        bb1 = jnp.tile(b1, (1, pack))                  # (1, H*p)
        bb2 = jnp.tile(b2, (1, pack))                  # (1, C*p)
    else:
        x_in, w1, bb1, w2, bb2 = x, w1t, b1, w2t, b2

    Nr, Cr = x_in.shape
    Hr = w1.shape[1]

    # ---- Small problem: single VMEM tile, no grid, no pipeline overhead. ----
    if Nr <= block_rows:
        out = pl.pallas_call(
            channel_attention_kernel,
            out_shape=jax.ShapeDtypeStruct((Nr, Cr), x.dtype),
            in_specs=[pl.BlockSpec(memory_space=pltpu.MemorySpace.VMEM)] * 5,
            out_specs=pl.BlockSpec(memory_space=pltpu.MemorySpace.VMEM),
        )(x_in, w1, bb1, w2, bb2)
        return out.reshape(N, C) if pack > 1 else out

    # ---- Streaming version: tile rows (no HBM pad/slice; Pallas masks the
    # ragged last tile), weights/biases VMEM-resident via constant maps. ----
    num_tiles = pl.cdiv(Nr, block_rows)
    itemsize = jnp.dtype(x.dtype).itemsize
    # NOTE: per-buffer tile is block_rows*Cr*itemsize; with default depth-2
    # in+out double buffering this is ~4x that — well inside even v5e's 16 MiB
    # scoped-VMEM default at these sizes (set vmem_limit_bytes if pushed >~8K rows).
    out = pl.pallas_call(
        channel_attention_kernel,
        out_shape=jax.ShapeDtypeStruct((Nr, Cr), x.dtype),
        grid=(num_tiles,),
        in_specs=[
            pl.BlockSpec((block_rows, Cr), lambda i: (i, 0)),  # x tile streams
            pl.BlockSpec((Cr, Hr), lambda i: (0, 0)),          # weights resident
            pl.BlockSpec((1, Hr), lambda i: (0, 0)),
            pl.BlockSpec((Hr, Cr), lambda i: (0, 0)),
            pl.BlockSpec((1, Cr), lambda i: (0, 0)),
        ],
        out_specs=pl.BlockSpec((block_rows, Cr), lambda i: (i, 0)),
        compiler_params=pltpu.CompilerParams(
            dimension_semantics=("parallel",),  # shard rows across TCs on v7x
        ),
        cost_estimate=pl.CostEstimate(
            flops=4 * Nr * Cr * Hr,
            transcendentals=Nr * Cr,
            bytes_accessed=2 * Nr * Cr * itemsize,
        ),
    )(x_in, w1, bb1, w2, bb2)
    return out.reshape(N, C) if pack > 1 else out


def reference(x, w1t, b1, w2t, b2):
    h = jnp.maximum(x @ w1t + b1, 0.0)
    y = jax.nn.sigmoid(h @ w2t + b2)
    return x * y


if __name__ == "__main__":
    # Module-consistent shapes: channel=64, reduction=16 -> hidden=4, batch=2.
    B, C, R = 2, 64, 16
    H = C // R

    key = jax.random.PRNGKey(0)
    kx, k1, k2, k3, k4, kb, kc = jax.random.split(key, 7)

    # PyTorch Linear shapes: fc1.weight (H, C), fc2.weight (C, H); stored here
    # pre-transposed for row-major MXU matmuls.
    bound1 = 1.0 / (C ** 0.5)
    bound2 = 1.0 / (H ** 0.5)
    w1t = jax.random.uniform(k1, (C, H), minval=-bound1, maxval=bound1, dtype=jnp.float32)
    b1 = jax.random.uniform(k2, (1, H), minval=-bound1, maxval=bound1, dtype=jnp.float32)
    w2t = jax.random.uniform(k3, (H, C), minval=-bound2, maxval=bound2, dtype=jnp.float32)
    b2 = jax.random.uniform(k4, (1, C), minval=-bound2, maxval=bound2, dtype=jnp.float32)

    # --- Case 1: the module's natural tiny call (single-tile, grid-less path) ---
    x_small = jax.random.normal(kx, (B, C), dtype=jnp.float32)
    out_small = jax.block_until_ready(channel_attention(x_small, w1t, b1, w2t, b2))
    ref_small = reference(x_small, w1t, b1, w2t, b2)
    assert out_small.shape == (B, C)
    assert jnp.allclose(out_small, ref_small, atol=1e-4, rtol=1e-4), "small-case mismatch"

    # --- Case 2: flattened (N, C) batch, even N -> lane-packed streaming path,
    # ragged last tile (no pad / no slice) ---
    N2 = 2400
    x_big = jax.random.normal(kb, (N2, C), dtype=jnp.float32)
    out_big = jax.block_until_ready(
        channel_attention(x_big, w1t, b1, w2t, b2, block_rows=512))
    ref_big = reference(x_big, w1t, b1, w2t, b2)
    assert out_big.shape == (N2, C)
    assert jnp.allclose(out_big, ref_big, atol=1e-4, rtol=1e-4), "packed-case mismatch"

    # --- Case 3: odd N -> unpacked streaming path with masked ragged tile ---
    N3 = 1001
    x_odd = jax.random.normal(kc, (N3, C), dtype=jnp.float32)
    out_odd = jax.block_until_ready(
        channel_attention(x_odd, w1t, b1, w2t, b2, block_rows=128))
    ref_odd = reference(x_odd, w1t, b1, w2t, b2)
    assert out_odd.shape == (N3, C)
    assert jnp.allclose(out_odd, ref_odd, atol=1e-4, rtol=1e-4), "ragged-case mismatch"

    print("KERNEL_OK")
</pallas_src>

<mosaic_0001>
module attributes {stable_mosaic.version = 11 : i64} {
  func.func @channel_attention_kernel(%arg0: memref<2x64xf32, #tpu.memory_space<vmem>>, %arg1: memref<64x4xf32, #tpu.memory_space<vmem>>, %arg2: memref<1x4xf32, #tpu.memory_space<vmem>>, %arg3: memref<4x64xf32, #tpu.memory_space<vmem>>, %arg4: memref<1x64xf32, #tpu.memory_space<vmem>>, %arg5: memref<2x64xf32, #tpu.memory_space<vmem>>) attributes {dimension_semantics = [], scalar_prefetch = 0 : i64, scratch_operands = 0 : i64, tpu.core_type = #tpu.core_type<tc>} {
    %c0 = arith.constant 0 : index
    %c0_0 = arith.constant 0 : index
    %0 = vector.load %arg0[%c0, %c0_0] : memref<2x64xf32, #tpu.memory_space<vmem>>, vector<2x64xf32>
    %c0_1 = arith.constant 0 : index
    %c0_2 = arith.constant 0 : index
    %1 = vector.load %arg1[%c0_1, %c0_2] : memref<64x4xf32, #tpu.memory_space<vmem>>, vector<64x4xf32>
    %cst = arith.constant dense<0.000000e+00> : vector<2x4xf32>
    %2 = tpu.matmul %0, %1, %cst {dimension_numbers = #tpu.dot_dimension_numbers<[1], [0], [0], [1], [0, 0, 1, 1], [], []>} : vector<2x64xf32>, vector<64x4xf32>, vector<2x4xf32> -> vector<2x4xf32>
    %c0_3 = arith.constant 0 : index
    %c0_4 = arith.constant 0 : index
    %3 = vector.load %arg2[%c0_3, %c0_4] : memref<1x4xf32, #tpu.memory_space<vmem>>, vector<1x4xf32>
    %4 = vector.broadcast %3 : vector<1x4xf32> to vector<2x4xf32>
    %5 = arith.addf %2, %4 : vector<2x4xf32>
    %cst_5 = arith.constant 0.000000e+00 : f32
    %6 = vector.broadcast %cst_5 : f32 to vector<2x4xf32>
    %7 = arith.maximumf %5, %6 : vector<2x4xf32>
    %c0_6 = arith.constant 0 : index
    %c0_7 = arith.constant 0 : index
    %8 = vector.load %arg3[%c0_6, %c0_7] : memref<4x64xf32, #tpu.memory_space<vmem>>, vector<4x64xf32>
    %cst_8 = arith.constant dense<0.000000e+00> : vector<2x64xf32>
    %9 = tpu.matmul %7, %8, %cst_8 {dimension_numbers = #tpu.dot_dimension_numbers<[1], [0], [0], [1], [0, 0, 1, 1], [], []>} : vector<2x4xf32>, vector<4x64xf32>, vector<2x64xf32> -> vector<2x64xf32>
    %c0_9 = arith.constant 0 : index
    %c0_10 = arith.constant 0 : index
    %10 = vector.load %arg4[%c0_9, %c0_10] : memref<1x64xf32, #tpu.memory_space<vmem>>, vector<1x64xf32>
    %11 = vector.broadcast %10 : vector<1x64xf32> to vector<2x64xf32>
    %12 = arith.addf %9, %11 : vector<2x64xf32>
    %13 = arith.negf %12 : vector<2x64xf32>
    %14 = math.exp %13 : vector<2x64xf32>
    %cst_11 = arith.constant 1.000000e+00 : f32
    %15 = vector.broadcast %cst_11 : f32 to vector<2x64xf32>
    %16 = arith.addf %15, %14 : vector<2x64xf32>
    %17 = arith.divf %15, %16 : vector<2x64xf32>
    %18 = arith.mulf %0, %17 : vector<2x64xf32>
    %c0_12 = arith.constant 0 : index
    %c0_13 = arith.constant 0 : index
    %19 = vector.load %arg5[%c0_12, %c0_13] : memref<2x64xf32, #tpu.memory_space<vmem>>, vector<2x64xf32>
    tpu.vector_store %arg5[%c0_12, %c0_13], %18 {strides = array<i32>} : memref<2x64xf32, #tpu.memory_space<vmem>>, vector<2x64xf32>,
    return
  }
}

</mosaic_0001>

<bundles_post_ra>
// kernel: tpu_custom_call.1
= control target key start
LH: loop header
LB: loop body
LE: loop exit
PB: predicated region body
PF: predicated region fallthrough
CT: control target
= control target key end

     0   :  { %v306_v3 = vmov 0.0|0.0   ;;  %vm307_vm0 = vmmov 0   ;;  %v308_v6 = vmov 0.0   ;;  %s388_s0 = inlined_call_operand.vmem [shape: f32[2,64], index: 0, kind: input, shape index: {}]   ;;  %s389_s1 = inlined_call_operand.vmem [shape: f32[64,4], index: 1, kind: input, shape index: {}]   ;;  %s390_s2 = inlined_call_operand.vmem [shape: f32[1,4], index: 2, kind: input, shape index: {}]   ;;  %s391_s3 = inlined_call_operand.vmem [shape: f32[4,64], index: 3, kind: input, shape index: {}]   ;;  %s392_s4 = inlined_call_operand.vmem [shape: f32[1,64], index: 4, kind: input, shape index: {}]   ;;  %s393_s5 = inlined_call_operand.hbm [shape: f32[2,64], index: 5, kind: output, shape index: {}]  }
   0x1   :  { %v22_v0 = vld [vmem:[%s389_s1] sm:$0xff]  ;;  %v23_v1 = vld [vmem:[%s389_s1 + $0x8] sm:$0xff]  ;;  %v24_v2 = vld [vmem:[%s389_s1 + $0x10] sm:$0xff]  ;;  %262 = vmatprep.subr.bf16.mxu0 %v306_v3  ;;  %254 = vmatprep.mubr.msk.f32.mxu0 %vm307_vm0, %v308_v6 }
   0x2   :  { %v263_v4 = vpack.c.bf16 %v23_v1, %v22_v0  ;;  %v25_v5 = vld [vmem:[%s389_s1 + $0x18] sm:$0xff]  ;;  %257 = vmatprep.subr.mxu1 %v308_v6  ;;  %259 = vmatprep.mubr.msk.f32.mxu1 %vm307_vm0, %v308_v6 }
   0x3   :  { %v266_v7 = vpack.c.bf16 %v25_v5, %v24_v2 }
   0x4   :  { %264 = vmatpush3.bf16.msra.mxu0 %v263_v4 }
   0x5   :  { %10 = vsyncpa [#allocation3], 0  ;;  %265 = vmatprep.subr.bf16.mxu0 %v306_v3  ;;  %v26_v8 = vld [vmem:[%s389_s1 + $0x20] sm:$0xff]  ;;  %v27_v9 = vld [vmem:[%s389_s1 + $0x28] sm:$0xff]  ;;  %vm37_vm1 = vcmask 523264   ;;  %vm124_vm2 = vcmask 1043456  }
   0x6   :  { %v269_v10 = vpack.c.bf16 %v27_v9, %v26_v8  ;;  %v28_v11 = vld [vmem:[%s389_s1 + $0x30] sm:$0xff]  ;;  %v29_v12 = vld [vmem:[%s389_s1 + $0x38] sm:$0xff]  ;;  %v21_v14 = vld [vmem:[%s388_s0] sm:$0x3]  ;;  %vm120_vm3 = vcmask 31744   ;;  %vm205_vm4 = vcmask 517120  }
   0x7   :  { %v272_v13 = vpack.c.bf16 %v29_v12, %v28_v11  ;;  %v112_v15 = vld [vmem:[%s391_s3] sm:$0xf]  ;;  %s309_s3 = smov [#allocation2]  }
   0x8   :  { %267 = vmatpush3.bf16.msra.mxu0 %v266_v7  ;;  %258 = vmatpush3.msk.msra.mxu1 %vm124_vm2, %v112_v15  ;;  %v221_v16 = vld [vmem:[%s390_s2] ss:$0 sm:$0xff]  ;;  %s213_s2 = sshll.u32 %s309_s3, 4  ;;  %s214_s2 = int_to_ptr.vmem [resolvable:$true] %s213_s2 }
   0x9   :  { %268 = vmatprep.subr.bf16.mxu0 %v306_v3  ;;  %v223_v21 = vld [vmem:[%s392_s4] ss:$0 sm:$0xff]  ;;  %s282_s15 = scalar_lea.vmem %s214_s2, 32  ;;  %p287_p1 = scmp.lt.s32.totalorder %s214_s2, %s214_s2 }
   0xa   :  { %p283_p0 = scmp.ne.s32.totalorder %s214_s2, %s282_s15  ;;  %p288_p2 = scmp.lt.s32.totalorder %s282_s15, %s282_s15 }
   0xc   :  { %270 = vmatpush3.bf16.msra.mxu0 %v269_v10  ;;  %p289_p3 = por %p288_p2, %p287_p1 }
   0xd   :  { %271 = vmatprep.subr.bf16.mxu0 %v306_v3 }
   0xe   :  { %p290_p4 = pnand %p289_p3, %p283_p0 }
  0x10   :  { %273 = vmatpush3.bf16.msra.mxu0 %v272_v13 }
  0x13   :  { %255 = vmatmul.mubr.msk.f32.vlgmr.msra.gmra.mrb[0].mxu0 %vm37_vm1, %v21_v14 }
  0xe6   :  { %v107_v17 = vpop.f32.mrb[0].mxu0 }
  0xe7   :  { %v108_v18 = vadd.f32 %v221_v16, %v107_v17  ;;  %v256_v19 = vpop.f32.mrb[1].mxu0 }
  0xe9   :  { %v111_v20 = vmax.f32 %v108_v18, 0.0 }
  0xeb   :  { %260 = vmatmul.mubr.msk.f32.vlgmr.msra.gmra.mrb[0].mxu1 %vm120_vm3, %v111_v20 }
 0x1be   :  { %v194_v22 = vpop.f32.mrb[0].mxu1 }
 0x1bf   :  { %v195_v23 = vadd.f32 %v223_v21, %v194_v22  ;;  %v261_v24 = vpop.f32.mrb[1].mxu1 }
 0x1c1   :  { %v226_v25 = vmul.f32 -1.442695, %v195_v23 }
 0x1c3   :  { %278 = vpow2.f32 %v226_v25 }
 0x1cd   :  { %v279_v26 = vpop.eup %278 }
 0x1ce   :  { %v201_v27 = vadd.f32 1.0, %v279_v26 }
 0x1d0   :  { %280 = vrcp.f32 %v201_v27 }
 0x1da   :  { %v281_v28 = vpop.eup %280 }
 0x1db   :  { %v204_v29 = vmul.f32 %v281_v28, %v21_v14 }
 0x1dd   :  { %206 = vst.msk [vmem:[#allocation2] sm:$0x3] %vm205_vm4, %v204_v29 }
 0x1de   :  { %293 = shalt.err (!%p290_p4)
}
 0x1df   :  { %s294_s17 = scalar_lea.hbm %s393_s5, 32 }
 0x1e0   :  { %p295_p5 = scmp.ne.s32.totalorder %s393_s5, %s294_s17  ;;  %p298_p6 = scmp.lt.u32.totalorder %s294_s17, %s393_s5 }
 0x1e2   :  { %p300_p7 = pnand %p298_p6, %p295_p5 }
 0x1e4   :  { %303 = shalt.err (!%p300_p7)
}
 0x1e5   :  { %216 = dma.vmem_to_hbm [thread:$0]  %s214_s2, 32, %s393_s5, [#allocation3]  }
 0x1e6   :  { %304 = dma.done.wait [#allocation3], 32  }
 0x1e7   :  { %305 = vsyncadd [#allocation3], 4294967264 }
 0x1e8   :  { %220 = vsyncpa [#allocation3], 1 }

</bundles_post_ra>
